<compile_context>
chip_gen: v7x
topology: tpu7x:2x2x1
jax: 0.10.0
libtpu: 0.0.40
codegen_flags: <defaults>
</compile_context>

<pallas_src>
import functools

import jax
import jax.numpy as jnp
from jax.experimental import pallas as pl


def _round_up(a, b):
    return (a + b - 1) // b * b


# ------------------------------ Pallas kernel ------------------------------ #
def _conv1d_same_kernel(x_ref, w_ref, o_ref, *, kernel_size, stride, out_w):
    # x_ref: (Cin_p, in_w)   w_ref: (K, Cout, Cin_p)   o_ref: (Cout, out_w)
    def tap(k):
        if stride == 1:
            xk = x_ref[:, pl.ds(k, out_w)]                    # shifted VMEM load
        else:
            # TODO(synk): stride>1 path (strided VMEM load) is untested by the
            # provided configs (module default stride=1).
            xk = x_ref[:, pl.ds(k, out_w, stride=stride)]     # strided VMEM load
        return jnp.dot(w_ref[k], xk, preferred_element_type=jnp.float32)

    acc = tap(0)
    for k in range(1, kernel_size):                           # K is small: static unroll
        acc = acc + tap(k)
    o_ref[...] = acc.astype(o_ref.dtype)


# -------------------------------- wrapper ---------------------------------- #
def conv1d_same_padding(x, weight, *, strides=1, dilation=1):
    """x: (N, Cin, L) f32.  weight: PyTorch layout (Cout, Cin, K), bias-free."""
    n, c_in, l = x.shape
    c_out, _, k = weight.shape

    out_rows = (l + strides - 1) // strides
    pad = max(0, (out_rows - 1) * strides + (k - 1) * dilation + 1 - l)
    l_pad = l + pad
    l_out = (l_pad - k) // strides + 1            # actual nn.Conv1d output length

    cin_p = _round_up(c_in, 8)                    # full sublane tiles feeding the MXU
    l_seg = _round_up(l_pad, strides)             # per-batch lane segment length
    w_seg = l_seg // strides                      # output positions per segment
    out_w = n * w_seg                             # lane-dense output width
    in_w = n * l_seg + (k - 1)                    # room for the shifted tap loads

    # Layout plumbing (wrapper side): fold the batch into the lane axis so the
    # kernel writes one lane-dense slab.  x_flat[ci, b*l_seg + t] = x[b, ci, t].
    x_p = jnp.pad(x.astype(jnp.float32),
                  ((0, 0), (0, cin_p - c_in), (0, l_seg - l)))
    x_flat = jnp.transpose(x_p, (1, 0, 2)).reshape(cin_p, n * l_seg)
    x_flat = jnp.pad(x_flat, ((0, 0), (0, in_w - n * l_seg)))

    # weight -> (K, Cout, Cin_p): w3d[k, co, ci] = weight[co, ci, k]
    w3d = jnp.pad(jnp.transpose(weight, (2, 0, 1)).astype(jnp.float32),
                  ((0, 0), (0, 0), (0, cin_p - c_in)))

    kernel = functools.partial(_conv1d_same_kernel,
                               kernel_size=k, stride=strides, out_w=out_w)

    out_flat = pl.pallas_call(
        kernel,
        out_shape=jax.ShapeDtypeStruct((c_out, out_w), jnp.float32),
        cost_estimate=pl.CostEstimate(
            flops=2 * k * cin_p * c_out * out_w,
            transcendentals=0,
            bytes_accessed=4 * (cin_p * in_w + k * c_out * cin_p + c_out * out_w)),
    )(x_flat, w3d)

    # (Cout, N*Wseg) -> (N, Cout, L_out); tail positions per segment are discarded.
    return jnp.transpose(out_flat.reshape(c_out, n, w_seg)[:, :, :l_out], (1, 0, 2))


# ------------------------------- reference --------------------------------- #
def conv1d_same_padding_ref(x, weight, *, strides=1, dilation=1):
    n, c_in, l = x.shape
    c_out, _, k = weight.shape
    out_rows = (l + strides - 1) // strides
    pad = max(0, (out_rows - 1) * strides + (k - 1) * dilation + 1 - l)
    x_pad = jnp.pad(x, ((0, 0), (0, 0), (0, pad)))
    return jax.lax.conv_general_dilated(
        x_pad, weight, window_strides=(strides,), padding="VALID",
        dimension_numbers=("NCH", "OIH", "NCH"))


# ----------------------------- weight init --------------------------------- #
def xavier_uniform_conv(key, c_out, c_in, k):
    fan_in, fan_out = c_in * k, c_out * k
    bound = (6.0 / (fan_in + fan_out)) ** 0.5
    return jax.random.uniform(key, (c_out, c_in, k), jnp.float32, -bound, bound)


# ---------------------------------- main ------------------------------------ #
if __name__ == "__main__":
    key = jax.random.PRNGKey(0)
    k_x1, k_w1, k_x2, k_w2 = jax.random.split(key, 4)

    # config 1: batch=4, Cin=4 -> Cout=16, L=16, kernel_size=3, stride=1
    x1 = jax.random.normal(k_x1, (4, 4, 16), jnp.float32)
    w1 = xavier_uniform_conv(k_w1, 16, 4, 3)
    out1 = jax.block_until_ready(conv1d_same_padding(x1, w1, strides=1, dilation=1))
    ref1 = jax.block_until_ready(conv1d_same_padding_ref(x1, w1, strides=1, dilation=1))
    assert out1.shape == ref1.shape == (4, 16, 16), (out1.shape, ref1.shape)
    assert jnp.allclose(out1, ref1, atol=1e-4, rtol=1e-4)

    # config 2: batch=2, Cin=8 -> Cout=32, L=20, kernel_size=5, stride=1
    x2 = jax.random.normal(k_x2, (2, 8, 20), jnp.float32)
    w2 = xavier_uniform_conv(k_w2, 32, 8, 5)
    out2 = jax.block_until_ready(conv1d_same_padding(x2, w2, strides=1, dilation=1))
    ref2 = jax.block_until_ready(conv1d_same_padding_ref(x2, w2, strides=1, dilation=1))
    assert out2.shape == ref2.shape == (2, 32, 20), (out2.shape, ref2.shape)
    assert jnp.allclose(out2, ref2, atol=1e-4, rtol=1e-4)

    print("KERNEL_OK")
</pallas_src>

<mosaic_0001>
module attributes {stable_mosaic.version = 11 : i64} {
  func.func @_conv1d_same_kernel(%arg0: memref<8x74xf32, #tpu.memory_space<vmem>>, %arg1: memref<3x16x8xf32, #tpu.memory_space<vmem>>, %arg2: memref<16x72xf32, #tpu.memory_space<vmem>>) attributes {dimension_semantics = [], scalar_prefetch = 0 : i64, scratch_operands = 0 : i64, tpu.core_type = #tpu.core_type<tc>} {
    %c0 = arith.constant 0 : index
    %c0_0 = arith.constant 0 : index
    %0 = vector.load %arg0[%c0, %c0_0] : memref<8x74xf32, #tpu.memory_space<vmem>>, vector<8x72xf32>
    %c0_1 = arith.constant 0 : index
    %c0_2 = arith.constant 0 : index
    %c0_3 = arith.constant 0 : index
    %1 = vector.load %arg1[%c0_1, %c0_2, %c0_3] : memref<3x16x8xf32, #tpu.memory_space<vmem>>, vector<1x16x8xf32>
    %2 = vector.shape_cast %1 : vector<1x16x8xf32> to vector<16x8xf32>
    %cst = arith.constant dense<0.000000e+00> : vector<16x72xf32>
    %3 = tpu.matmul %2, %0, %cst {dimension_numbers = #tpu.dot_dimension_numbers<[1], [0], [0], [1], [0, 0, 1, 1], [], []>} : vector<16x8xf32>, vector<8x72xf32>, vector<16x72xf32> -> vector<16x72xf32>
    %c0_4 = arith.constant 0 : index
    %c1 = arith.constant 1 : index
    %4 = vector.load %arg0[%c0_4, %c1] : memref<8x74xf32, #tpu.memory_space<vmem>>, vector<8x72xf32>
    %c1_5 = arith.constant 1 : index
    %c0_6 = arith.constant 0 : index
    %c0_7 = arith.constant 0 : index
    %5 = vector.load %arg1[%c1_5, %c0_6, %c0_7] : memref<3x16x8xf32, #tpu.memory_space<vmem>>, vector<1x16x8xf32>
    %6 = vector.shape_cast %5 : vector<1x16x8xf32> to vector<16x8xf32>
    %cst_8 = arith.constant dense<0.000000e+00> : vector<16x72xf32>
    %7 = tpu.matmul %6, %4, %cst_8 {dimension_numbers = #tpu.dot_dimension_numbers<[1], [0], [0], [1], [0, 0, 1, 1], [], []>} : vector<16x8xf32>, vector<8x72xf32>, vector<16x72xf32> -> vector<16x72xf32>
    %8 = arith.addf %3, %7 : vector<16x72xf32>
    %c0_9 = arith.constant 0 : index
    %c2 = arith.constant 2 : index
    %9 = vector.load %arg0[%c0_9, %c2] : memref<8x74xf32, #tpu.memory_space<vmem>>, vector<8x72xf32>
    %c2_10 = arith.constant 2 : index
    %c0_11 = arith.constant 0 : index
    %c0_12 = arith.constant 0 : index
    %10 = vector.load %arg1[%c2_10, %c0_11, %c0_12] : memref<3x16x8xf32, #tpu.memory_space<vmem>>, vector<1x16x8xf32>
    %11 = vector.shape_cast %10 : vector<1x16x8xf32> to vector<16x8xf32>
    %cst_13 = arith.constant dense<0.000000e+00> : vector<16x72xf32>
    %12 = tpu.matmul %11, %9, %cst_13 {dimension_numbers = #tpu.dot_dimension_numbers<[1], [0], [0], [1], [0, 0, 1, 1], [], []>} : vector<16x8xf32>, vector<8x72xf32>, vector<16x72xf32> -> vector<16x72xf32>
    %13 = arith.addf %8, %12 : vector<16x72xf32>
    %c0_14 = arith.constant 0 : index
    %c0_15 = arith.constant 0 : index
    %14 = vector.load %arg2[%c0_14, %c0_15] : memref<16x72xf32, #tpu.memory_space<vmem>>, vector<16x72xf32>
    tpu.vector_store %arg2[%c0_14, %c0_15], %13 {strides = array<i32>} : memref<16x72xf32, #tpu.memory_space<vmem>>, vector<16x72xf32>,
    return
  }
}

</mosaic_0001>

<bundles_post_ra>
// kernel: tpu_custom_call.1
= control target key start
LH: loop header
LB: loop body
LE: loop exit
PB: predicated region body
PF: predicated region fallthrough
CT: control target
= control target key end

     0   :  { %vm22_vm0 = vcmask 64512   ;;  %s360_s15 = smov 127   ;;  %s419_s0 = inlined_call_operand.vmem [shape: f32[8,74], index: 0, kind: input, shape index: {}]   ;;  %s420_s1 = inlined_call_operand.vmem [shape: f32[3,16,8], index: 1, kind: input, shape index: {}]   ;;  %s421_s2 = inlined_call_operand.hbm [shape: f32[16,72], index: 2, kind: output, shape index: {}]  }
   0x1   :  { %v12_v0 = vld [vmem:[%s419_s0] sm:$0xff]  ;;  %v14_v2 = vld [vmem:[%s420_s1 + $0x8] sm:$0xff]  ;;  %v293_v3 = vld [vmem:[%s420_s1 + $0x10] sm:$0xff] }
   0x2   :  { %v13_v1 = vld [vmem:[%s420_s1] sm:$0xff]  ;;  %19 = vrot.lane.b32.xlu0 %v12_v0, %s360_s15  ;;  %317 = vmatprep.subr.mxu0 %v12_v0 }
   0x3   :  { %v299_v4 = vld [vmem:[%s420_s1 + $0x20] sm:$0xff]  ;;  %318 = vmatpush3.msra.mxu0 %v12_v0  ;;  %319 = vmatprep.mubr.msk.f32.mxu0 %vm22_vm0, %v13_v1 }
   0x4   :  { %7 = vsyncpa [#allocation3], 0  ;;  %320 = vmatmul.mubr.msk.f32.vlgmr.msra.gmra.mrb[0].mxu0 %vm22_vm0, %v14_v2  ;;  %314 = vmatprep.mubr.msk.f32.mxu1 %vm22_vm0, %v293_v3  ;;  %s361_s0 = smov 126   ;;  %v294_v6 = vld [vmem:[%s420_s1 + $0x18] sm:$0xff]  ;;  %v300_v8 = vld [vmem:[%s420_s1 + $0x28] sm:$0xff]  ;;  %s362_s24 = smov [#allocation2]  }
   0x5   :  { %324 = vmatprep.mubr.msk.f32.mxu0 %vm22_vm0, %v299_v4  ;;  %s282_s25 = sshll.u32 %s362_s24, 4  ;;  %vm274_vm1 = vcmask 588800   ;;  %s283_s25 = int_to_ptr.vmem [resolvable:$true] %s282_s25 }
   0x6   :  { %188 = vrot.lane.b32.xlu0 %v12_v0, %s361_s0  ;;  %s336_s26 = scalar_lea.vmem %s283_s25, 256  ;;  %p341_p1 = scmp.lt.s32.totalorder %s283_s25, %s283_s25 }
   0x7   :  { %p337_p0 = scmp.ne.s32.totalorder %s283_s25, %s336_s26  ;;  %p342_p2 = scmp.lt.s32.totalorder %s336_s26, %s336_s26 }
   0x9   :  { %p343_p3 = por %p342_p2, %p341_p1 }
   0xb   :  { %p344_p4 = pnand %p343_p3, %p337_p0 }
  0x74   :  { %v20_v5 = vpop.permute.xlu0 %19 }
  0x75   :  { %312 = vmatprep.subr.mxu1 %v20_v5 }
  0x76   :  { %313 = vmatpush3.msra.mxu1 %v20_v5 }
  0x77   :  { %315 = vmatmul.mubr.msk.f32.vlgmr.msra.gmra.mrb[0].mxu1 %vm22_vm0, %v294_v6 }
  0x78   :  { %v189_v7 = vpop.permute.xlu0 %188 }
  0x79   :  { %322 = vmatprep.subr.mxu0 %v189_v7 }
  0x7a   :  { %323 = vmatpush3.msra.mxu0 %v189_v7 }
  0x7b   :  { %325 = vmatmul.mubr.msk.f32.vlgmr.msra.gmra.mrb[0].mxu0 %vm22_vm0, %v300_v8 }
 0x14a   :  { %v316_v9 = vpop.f32.mrb[0].mxu1 }
 0x14b   :  { %v95_v10 = vpop.f32.mrb[1].mxu1 }
 0x14e   :  { %v326_v11 = vpop.f32.mrb[0].mxu0 }
 0x14f   :  { %v327_v12 = vadd.f32 %v326_v11, %v316_v9  ;;  %v263_v13 = vpop.f32.mrb[1].mxu0 }
 0x150   :  { %v328_v14 = vadd.f32 %v263_v13, %v95_v10 }
 0x151   :  { %276 = vst.msk [vmem:[#allocation2 + $0x8] sm:$0xff] %vm274_vm1, %v327_v12 }
 0x152   :  { %275 = vst.msk [vmem:[#allocation2] sm:$0xff] %vm274_vm1, %v328_v14 }
 0x153   :  { %347 = shalt.err (!%p344_p4)
}
 0x154   :  { %s348_s28 = scalar_lea.hbm %s421_s2, 256 }
 0x155   :  { %p349_p5 = scmp.ne.s32.totalorder %s421_s2, %s348_s28  ;;  %p352_p6 = scmp.lt.u32.totalorder %s348_s28, %s421_s2 }
 0x157   :  { %p354_p7 = pnand %p352_p6, %p349_p5 }
 0x159   :  { %357 = shalt.err (!%p354_p7)
}
 0x15a   :  { %s363_s5 = smov 128   ;;  %s364_s6 = smov 8  }
 0x15b   :  { %288 = dma.vmem_to_hbm [thread:$0]  %s283_s25, 256, %s421_s2, [#allocation3], %s363_s5, %s363_s5, %s364_s6  }
 0x15c   :  { %358 = dma.done.wait [#allocation3], 256  }
 0x15d   :  { %359 = vsyncadd [#allocation3], 4294967040 }
 0x15e   :  { %292 = vsyncpa [#allocation3], 1 }

</bundles_post_ra>
